<compile_context>
chip_gen: v7x
topology: tpu7x:2x2x1
jax: 0.10.0
libtpu: 0.0.40
codegen_flags: <defaults>
</compile_context>

<pallas_src>
import functools

import jax
import jax.numpy as jnp
from jax.experimental import pallas as pl
from jax.experimental.pallas import tpu as pltpu

INPUT_DIM = 46
D_IN = 128
H1 = 64
H2 = 32

ROW_ALIGN = 128        # lane width: keeps the output row lane-dense
DEFAULT_TILE_N = 2048  # rows per grid step (review: 2048-4096)
MAX_TILE_N = 4096      # cap keeps the working set modest on v7x (64 MiB VMEM)


def _round_up(v, m):
    return ((v + m - 1) // m) * m


def _ranknet_kernel(x_ref, w1_ref, b1_ref, w2_ref, b2_ref, w3_ref, b3_ref,
                    w4t_ref, b4_ref, o_ref, *, lane_dense_out):
    # x tile: (tile_n, 46) f32 straight from HBM; cast to bf16 in-kernel (VPU slack).
    h = x_ref[...].astype(jnp.bfloat16)

    # MXU dots accumulate in f32; ReLU + bf16 downcast fused so only the bf16
    # intermediate is materialized between layers (halves spill traffic).
    h = jnp.dot(h, w1_ref[...], preferred_element_type=jnp.float32)
    h = jnp.maximum(h + b1_ref[...], 0.0).astype(jnp.bfloat16)

    h = jnp.dot(h, w2_ref[...], preferred_element_type=jnp.float32)
    h = jnp.maximum(h + b2_ref[...], 0.0).astype(jnp.bfloat16)

    h = jnp.dot(h, w3_ref[...], preferred_element_type=jnp.float32)
    h = jnp.maximum(h + b3_ref[...], 0.0)      # stays f32 for the VPU final layer

    # Final (32 -> 1) layer on the VPU/XLU: broadcast-multiply + lane reduce,
    # avoiding a 1-output-column / M=1 MXU pass (keeps MXU pass count minimal).
    w4 = w4t_ref[...].astype(jnp.float32)                        # (1, 32)
    score = jnp.sum(h * w4, axis=-1, keepdims=True) + b4_ref[...]  # (tile_n, 1)
    score = jnp.maximum(score, 0.0)  # forward() applies relu after the last Linear too

    if lane_dense_out:
        # Lane-dense store: transpose the small score column on the XLU and
        # write one dense (1, tile_n) row per grid step.
        o_ref[0] = jnp.transpose(score, (1, 0)).astype(o_ref.dtype)
    else:
        o_ref[...] = score.astype(o_ref.dtype)


def _resident(shape):
    # Full-array block with a constant index_map -> stays VMEM-resident across grid.
    return pl.BlockSpec(shape, lambda i: (0,) * len(shape))


def _pick_tile_n(n, requested):
    """Rows per grid step: multiple of 128 when possible (lane-dense output),
    never larger than the input, and split into >=2 tiles for moderately large
    inputs so both v7x TensorCores get work on the 'parallel' grid axis."""
    cap = DEFAULT_TILE_N if requested is None else requested
    cap = max(8, min(int(cap), MAX_TILE_N))
    cap = (cap // 8) * 8
    if n <= ROW_ALIGN or cap < ROW_ALIGN:
        return min(n, cap)                                 # tiny input / tiny tile
    tile = (min(n, cap) // ROW_ALIGN) * ROW_ALIGN          # 128-aligned, <= n
    if requested is None and n > 1024 and pl.cdiv(n, tile) == 1:
        tile = min(tile, _round_up((n + 1) // 2, ROW_ALIGN))   # >=2 grid steps
    return tile


def ranknet_forward(x, params, *, tile_n=None):
    """x: (N, 46) float32.  params: dict of f32 weights/biases.  Returns (N, 1) f32."""
    n = x.shape[0]
    tile = _pick_tile_n(n, tile_n)
    num_tiles = pl.cdiv(n, tile)
    n_pad = num_tiles * tile

    # Weights travel as bf16 (half HBM traffic, native MXU rate); biases stay f32
    # (bias-add / ReLU epilogue kept f32 so the same kernel is v5e-safe).
    w1 = params["w1"].astype(jnp.bfloat16)
    w2 = params["w2"].astype(jnp.bfloat16)
    w3 = params["w3"].astype(jnp.bfloat16)
    w4t = params["w4"].T.astype(jnp.bfloat16)          # (1, 32)
    b1 = params["b1"].astype(jnp.float32)
    b2 = params["b2"].astype(jnp.float32)
    b3 = params["b3"].astype(jnp.float32)
    b4 = params["b4"].astype(jnp.float32)

    in_specs = [
        pl.BlockSpec((tile, INPUT_DIM), lambda i: (i, 0)),   # x tile streams (double-buffered)
        _resident(w1.shape), _resident(b1.shape),
        _resident(w2.shape), _resident(b2.shape),
        _resident(w3.shape), _resident(b3.shape),
        _resident(w4t.shape), _resident(b4.shape),
    ]

    flops = 2 * n_pad * (INPUT_DIM * D_IN + D_IN * H1 + H1 * H2 + H2 * 1)
    weight_bytes = 2 * (INPUT_DIM * D_IN + D_IN * H1 + H1 * H2 + H2) \
        + 4 * (D_IN + H1 + H2 + 1)
    bytes_accessed = n_pad * (INPUT_DIM * 4 + 4) + weight_bytes
    cost = pl.CostEstimate(flops=flops, transcendentals=0,
                           bytes_accessed=bytes_accessed)

    # Computed VMEM budget: ~16 MiB at the default tile (2048), ~28 MiB at the
    # 4096 cap — inside v7x's 64 MiB physical VMEM, far below v5e/v6e's 128 MiB.
    vmem_limit = int(min(100 << 20, max(16 << 20, tile * 128 * 4 * 14)))
    cparams = pltpu.CompilerParams(dimension_semantics=("parallel",),
                                   vmem_limit_bytes=vmem_limit)

    def call(lane_dense):
        if lane_dense:
            out_shape = jax.ShapeDtypeStruct((num_tiles, 1, tile), jnp.float32)
            out_spec = pl.BlockSpec((1, 1, tile), lambda i: (i, 0, 0))
        else:
            out_shape = jax.ShapeDtypeStruct((n_pad, 1), jnp.float32)
            out_spec = pl.BlockSpec((tile, 1), lambda i: (i, 0))
        return pl.pallas_call(
            functools.partial(_ranknet_kernel, lane_dense_out=lane_dense),
            out_shape=out_shape,
            grid=(num_tiles,),
            in_specs=in_specs,
            out_specs=out_spec,
            compiler_params=cparams,
            cost_estimate=cost,
        )(x, w1, b1, w2, b2, w3, b3, w4t, b4)

    try:
        out = call(lane_dense=True)                 # preferred lane-dense layout
        return out.reshape(n_pad, 1)[:n]
    except Exception:
        # Insurance: if the in-kernel (tile,1)->(1,tile) relayout fails to lower
        # on some toolchain, fall back to the known-good column-output layout.
        out = call(lane_dense=False)
        return out[:n]


def init_params(key):
    """Deterministic init mimicking PyTorch Linear default U[-1/sqrt(fan_in), +1/sqrt(fan_in)]."""
    dims = [(INPUT_DIM, D_IN), (D_IN, H1), (H1, H2), (H2, 1)]
    params = {}
    keys = jax.random.split(key, 2 * len(dims))
    for i, (fan_in, fan_out) in enumerate(dims):
        bound = 1.0 / jnp.sqrt(jnp.float32(fan_in))
        params[f"w{i + 1}"] = jax.random.uniform(
            keys[2 * i], (fan_in, fan_out), minval=-bound, maxval=bound,
            dtype=jnp.float32)
        params[f"b{i + 1}"] = jax.random.uniform(
            keys[2 * i + 1], (1, fan_out), minval=-bound, maxval=bound,
            dtype=jnp.float32)
    return params


def ranknet_forward_ref_bf16(x, params):
    """Pure-JAX reference with the same bf16-input / f32-accumulate precision choices."""
    h = x.astype(jnp.bfloat16)
    for i in range(1, 4):
        h = jnp.dot(h, params[f"w{i}"].astype(jnp.bfloat16),
                    preferred_element_type=jnp.float32) + params[f"b{i}"]
        h = jnp.maximum(h, 0.0)
        if i < 3:
            h = h.astype(jnp.bfloat16)
    w4 = params["w4"].astype(jnp.bfloat16).astype(jnp.float32)
    score = jnp.sum(h * w4.T, axis=-1, keepdims=True) + params["b4"]
    return jnp.maximum(score, 0.0)


def ranknet_forward_ref_f32(x, params):
    """Full-f32 reference of the original module's forward (eval-mode dropout)."""
    h = x
    for i in range(1, 5):
        h = jnp.maximum(h @ params[f"w{i}"] + params[f"b{i}"], 0.0)
    return h


if __name__ == "__main__":
    key = jax.random.PRNGKey(0)
    pkey, xkey, xkey2 = jax.random.split(key, 3)
    params = init_params(pkey)

    # One query with N=8 documents, 46 LTR features each (MQ2007-style).
    x = jax.random.normal(xkey, (8, INPUT_DIM), dtype=jnp.float32)
    out = jax.block_until_ready(ranknet_forward(x, params))
    assert out.shape == (8, 1), out.shape
    assert jnp.allclose(out, ranknet_forward_ref_bf16(x, params),
                        atol=2e-3, rtol=2e-3), "mismatch vs bf16 reference (N=8)"
    assert jnp.allclose(out, ranknet_forward_ref_f32(x, params),
                        atol=5e-2, rtol=5e-2), "mismatch vs f32 reference (N=8)"

    # Multi-tile path (grid > 1, ragged last tile): 300 rows with a 128-row tile.
    x2 = jax.random.normal(xkey2, (300, INPUT_DIM), dtype=jnp.float32)
    out2 = jax.block_until_ready(ranknet_forward(x2, params, tile_n=128))
    assert out2.shape == (300, 1), out2.shape
    assert jnp.allclose(out2, ranknet_forward_ref_bf16(x2, params),
                        atol=2e-3, rtol=2e-3), "mismatch vs bf16 reference (N=300)"

    print("KERNEL_OK")
</pallas_src>

<mosaic_0001>
module attributes {stable_mosaic.version = 11 : i64} {
  func.func @_ranknet_kernel(%arg0: i32, %arg1: memref<8x46xf32, #tpu.memory_space<vmem>>, %arg2: memref<46x128xbf16, #tpu.memory_space<vmem>>, %arg3: memref<1x128xf32, #tpu.memory_space<vmem>>, %arg4: memref<128x64xbf16, #tpu.memory_space<vmem>>, %arg5: memref<1x64xf32, #tpu.memory_space<vmem>>, %arg6: memref<64x32xbf16, #tpu.memory_space<vmem>>, %arg7: memref<1x32xf32, #tpu.memory_space<vmem>>, %arg8: memref<1x32xbf16, #tpu.memory_space<vmem>>, %arg9: memref<1x1xf32, #tpu.memory_space<vmem>>, %arg10: memref<1x1x8xf32, #tpu.memory_space<vmem>>) attributes {dimension_semantics = [#tpu.dimension_semantics<parallel>], iteration_bounds = array<i64: 1>, scalar_prefetch = 0 : i64, scratch_operands = 0 : i64, tpu.core_type = #tpu.core_type<tc>, window_params = [{transform_indices = @transform_0, window_bounds = array<i64: 8, 46>}, {pipeline_mode = #tpu.pipeline_mode<synchronous>, transform_indices = @transform_1, window_bounds = array<i64: 46, 128>}, {pipeline_mode = #tpu.pipeline_mode<synchronous>, transform_indices = @transform_2, window_bounds = array<i64: 1, 128>}, {pipeline_mode = #tpu.pipeline_mode<synchronous>, transform_indices = @transform_3, window_bounds = array<i64: 128, 64>}, {pipeline_mode = #tpu.pipeline_mode<synchronous>, transform_indices = @transform_4, window_bounds = array<i64: 1, 64>}, {pipeline_mode = #tpu.pipeline_mode<synchronous>, transform_indices = @transform_5, window_bounds = array<i64: 64, 32>}, {pipeline_mode = #tpu.pipeline_mode<synchronous>, transform_indices = @transform_6, window_bounds = array<i64: 1, 32>}, {pipeline_mode = #tpu.pipeline_mode<synchronous>, transform_indices = @transform_7, window_bounds = array<i64: 1, 32>}, {pipeline_mode = #tpu.pipeline_mode<synchronous>, transform_indices = @transform_8, window_bounds = array<i64: 1, 1>}, {transform_indices = @transform_9, window_bounds = array<i64: 1, 1, 8>}]} {
    %c0 = arith.constant 0 : index
    %c0_0 = arith.constant 0 : index
    %0 = vector.load %arg1[%c0, %c0_0] : memref<8x46xf32, #tpu.memory_space<vmem>>, vector<8x46xf32>
    %1 = arith.truncf %0 : vector<8x46xf32> to vector<8x46xbf16>
    %c0_1 = arith.constant 0 : index
    %c0_2 = arith.constant 0 : index
    %2 = vector.load %arg2[%c0_1, %c0_2] : memref<46x128xbf16, #tpu.memory_space<vmem>>, vector<46x128xbf16>
    %cst = arith.constant dense<0.000000e+00> : vector<8x128xf32>
    %3 = tpu.matmul %1, %2, %cst {dimension_numbers = #tpu.dot_dimension_numbers<[1], [0], [0], [1], [0, 0, 1, 1], [], []>} : vector<8x46xbf16>, vector<46x128xbf16>, vector<8x128xf32> -> vector<8x128xf32>
    %c0_3 = arith.constant 0 : index
    %c0_4 = arith.constant 0 : index
    %4 = vector.load %arg3[%c0_3, %c0_4] : memref<1x128xf32, #tpu.memory_space<vmem>>, vector<1x128xf32>
    %5 = vector.broadcast %4 : vector<1x128xf32> to vector<8x128xf32>
    %6 = arith.addf %3, %5 : vector<8x128xf32>
    %cst_5 = arith.constant 0.000000e+00 : f32
    %7 = vector.broadcast %cst_5 : f32 to vector<8x128xf32>
    %8 = arith.maximumf %6, %7 : vector<8x128xf32>
    %9 = arith.truncf %8 : vector<8x128xf32> to vector<8x128xbf16>
    %c0_6 = arith.constant 0 : index
    %c0_7 = arith.constant 0 : index
    %10 = vector.load %arg4[%c0_6, %c0_7] : memref<128x64xbf16, #tpu.memory_space<vmem>>, vector<128x64xbf16>
    %cst_8 = arith.constant dense<0.000000e+00> : vector<8x64xf32>
    %11 = tpu.matmul %9, %10, %cst_8 {dimension_numbers = #tpu.dot_dimension_numbers<[1], [0], [0], [1], [0, 0, 1, 1], [], []>} : vector<8x128xbf16>, vector<128x64xbf16>, vector<8x64xf32> -> vector<8x64xf32>
    %c0_9 = arith.constant 0 : index
    %c0_10 = arith.constant 0 : index
    %12 = vector.load %arg5[%c0_9, %c0_10] : memref<1x64xf32, #tpu.memory_space<vmem>>, vector<1x64xf32>
    %13 = vector.broadcast %12 : vector<1x64xf32> to vector<8x64xf32>
    %14 = arith.addf %11, %13 : vector<8x64xf32>
    %cst_11 = arith.constant 0.000000e+00 : f32
    %15 = vector.broadcast %cst_11 : f32 to vector<8x64xf32>
    %16 = arith.maximumf %14, %15 : vector<8x64xf32>
    %17 = arith.truncf %16 : vector<8x64xf32> to vector<8x64xbf16>
    %c0_12 = arith.constant 0 : index
    %c0_13 = arith.constant 0 : index
    %18 = vector.load %arg6[%c0_12, %c0_13] : memref<64x32xbf16, #tpu.memory_space<vmem>>, vector<64x32xbf16>
    %cst_14 = arith.constant dense<0.000000e+00> : vector<8x32xf32>
    %19 = tpu.matmul %17, %18, %cst_14 {dimension_numbers = #tpu.dot_dimension_numbers<[1], [0], [0], [1], [0, 0, 1, 1], [], []>} : vector<8x64xbf16>, vector<64x32xbf16>, vector<8x32xf32> -> vector<8x32xf32>
    %c0_15 = arith.constant 0 : index
    %c0_16 = arith.constant 0 : index
    %20 = vector.load %arg7[%c0_15, %c0_16] : memref<1x32xf32, #tpu.memory_space<vmem>>, vector<1x32xf32>
    %21 = vector.broadcast %20 : vector<1x32xf32> to vector<8x32xf32>
    %22 = arith.addf %19, %21 : vector<8x32xf32>
    %cst_17 = arith.constant 0.000000e+00 : f32
    %23 = vector.broadcast %cst_17 : f32 to vector<8x32xf32>
    %24 = arith.maximumf %22, %23 : vector<8x32xf32>
    %c0_18 = arith.constant 0 : index
    %c0_19 = arith.constant 0 : index
    %25 = vector.load %arg8[%c0_18, %c0_19] : memref<1x32xbf16, #tpu.memory_space<vmem>>, vector<1x32xbf16>
    %26 = arith.extf %25 : vector<1x32xbf16> to vector<1x32xf32>
    %27 = vector.broadcast %26 : vector<1x32xf32> to vector<8x32xf32>
    %28 = arith.mulf %24, %27 : vector<8x32xf32>
    %cst_20 = arith.constant dense<0.000000e+00> : vector<8xf32>
    %29 = vector.multi_reduction <add>, %28, %cst_20 [1] : vector<8x32xf32> to vector<8xf32>
    %30 = vector.shape_cast %29 : vector<8xf32> to vector<8x1xf32>
    %c0_21 = arith.constant 0 : index
    %c0_22 = arith.constant 0 : index
    %31 = vector.load %arg9[%c0_21, %c0_22] : memref<1x1xf32, #tpu.memory_space<vmem>>, vector<1x1xf32>
    %32 = vector.broadcast %31 : vector<1x1xf32> to vector<8x1xf32>
    %33 = arith.addf %30, %32 : vector<8x1xf32>
    %cst_23 = arith.constant 0.000000e+00 : f32
    %34 = vector.broadcast %cst_23 : f32 to vector<8x1xf32>
    %35 = arith.maximumf %33, %34 : vector<8x1xf32>
    %36 = tpu.transpose %35, [1, 0] : vector<8x1xf32> -> vector<1x8xf32>
    %c0_24 = arith.constant 0 : index
    %c0_25 = arith.constant 0 : index
    %c0_26 = arith.constant 0 : index
    %37 = vector.load %arg10[%c0_24, %c0_25, %c0_26] : memref<1x1x8xf32, #tpu.memory_space<vmem>>, vector<1x1x8xf32>
    %38 = vector.shape_cast %37 : vector<1x1x8xf32> to vector<1x8xf32>
    %39 = vector.shape_cast %36 : vector<1x8xf32> to vector<1x1x8xf32>
    tpu.vector_store %arg10[%c0_24, %c0_25, %c0_26], %39 {strides = array<i32>} : memref<1x1x8xf32, #tpu.memory_space<vmem>>, vector<1x1x8xf32>,
    return
  }
  func.func @transform_0(%arg0: i32) -> (i32, i32) {
    %c0_i32 = arith.constant 0 : i32
    %c0_i32_0 = arith.constant 0 : i32
    return %arg0, %c0_i32 : i32, i32
  }
  func.func @transform_1(%arg0: i32) -> (i32, i32) {
    %c0_i32 = arith.constant 0 : i32
    %c0_i32_0 = arith.constant 0 : i32
    %c0_i32_1 = arith.constant 0 : i32
    return %c0_i32, %c0_i32_0 : i32, i32
  }
  func.func @transform_2(%arg0: i32) -> (i32, i32) {
    %c0_i32 = arith.constant 0 : i32
    %c0_i32_0 = arith.constant 0 : i32
    %c0_i32_1 = arith.constant 0 : i32
    return %c0_i32, %c0_i32_0 : i32, i32
  }
  func.func @transform_3(%arg0: i32) -> (i32, i32) {
    %c0_i32 = arith.constant 0 : i32
    %c0_i32_0 = arith.constant 0 : i32
    %c0_i32_1 = arith.constant 0 : i32
    return %c0_i32, %c0_i32_0 : i32, i32
  }
  func.func @transform_4(%arg0: i32) -> (i32, i32) {
    %c0_i32 = arith.constant 0 : i32
    %c0_i32_0 = arith.constant 0 : i32
    %c0_i32_1 = arith.constant 0 : i32
    return %c0_i32, %c0_i32_0 : i32, i32
  }
  func.func @transform_5(%arg0: i32) -> (i32, i32) {
    %c0_i32 = arith.constant 0 : i32
    %c0_i32_0 = arith.constant 0 : i32
    %c0_i32_1 = arith.constant 0 : i32
    return %c0_i32, %c0_i32_0 : i32, i32
  }
  func.func @transform_6(%arg0: i32) -> (i32, i32) {
    %c0_i32 = arith.constant 0 : i32
    %c0_i32_0 = arith.constant 0 : i32
    %c0_i32_1 = arith.constant 0 : i32
    return %c0_i32, %c0_i32_0 : i32, i32
  }
  func.func @transform_7(%arg0: i32) -> (i32, i32) {
    %c0_i32 = arith.constant 0 : i32
    %c0_i32_0 = arith.constant 0 : i32
    %c0_i32_1 = arith.constant 0 : i32
    return %c0_i32, %c0_i32_0 : i32, i32
  }
  func.func @transform_8(%arg0: i32) -> (i32, i32) {
    %c0_i32 = arith.constant 0 : i32
    %c0_i32_0 = arith.constant 0 : i32
    %c0_i32_1 = arith.constant 0 : i32
    return %c0_i32, %c0_i32_0 : i32, i32
  }
  func.func @transform_9(%arg0: i32) -> (i32, i32, i32) {
    %c0_i32 = arith.constant 0 : i32
    %c0_i32_0 = arith.constant 0 : i32
    %c0_i32_1 = arith.constant 0 : i32
    return %arg0, %c0_i32, %c0_i32_0 : i32, i32, i32
  }
}

module attributes {stable_mosaic.version = 11 : i64} {
  func.func @_ranknet_kernel(%arg0: i32, %arg1: memref<8x46xf32, #tpu.memory_space<vmem>>, %arg2: memref<46x128xbf16, #tpu.memory_space<vmem>>, %arg3: memref<1x128xf32, #tpu.memory_space<vmem>>, %arg4: memref<128x64xbf16, #tpu.memory_space<vmem>>, %arg5: memref<1x64xf32, #tpu.memory_space<vmem>>, %arg6: memref<64x32xbf16, #tpu.memory_space<vmem>>, %arg7: memref<1x32xf32, #tpu.memory_space<vmem>>, %arg8: memref<1x32xbf16, #tpu.memory_space<vmem>>, %arg9: memref<1x1xf32, #tpu.memory_space<vmem>>, %arg10: memref<8x1xf32, #tpu.memory_space<vmem>>) attributes {dimension_semantics = [#tpu.dimension_semantics<parallel>], iteration_bounds = array<i64: 1>, scalar_prefetch = 0 : i64, scratch_operands = 0 : i64, tpu.core_type = #tpu.core_type<tc>, window_params = [{transform_indices = @transform_0, window_bounds = array<i64: 8, 46>}, {pipeline_mode = #tpu.pipeline_mode<synchronous>, transform_indices = @transform_1, window_bounds = array<i64: 46, 128>}, {pipeline_mode = #tpu.pipeline_mode<synchronous>, transform_indices = @transform_2, window_bounds = array<i64: 1, 128>}, {pipeline_mode = #tpu.pipeline_mode<synchronous>, transform_indices = @transform_3, window_bounds = array<i64: 128, 64>}, {pipeline_mode = #tpu.pipeline_mode<synchronous>, transform_indices = @transform_4, window_bounds = array<i64: 1, 64>}, {pipeline_mode = #tpu.pipeline_mode<synchronous>, transform_indices = @transform_5, window_bounds = array<i64: 64, 32>}, {pipeline_mode = #tpu.pipeline_mode<synchronous>, transform_indices = @transform_6, window_bounds = array<i64: 1, 32>}, {pipeline_mode = #tpu.pipeline_mode<synchronous>, transform_indices = @transform_7, window_bounds = array<i64: 1, 32>}, {pipeline_mode = #tpu.pipeline_mode<synchronous>, transform_indices = @transform_8, window_bounds = array<i64: 1, 1>}, {transform_indices = @transform_9, window_bounds = array<i64: 8, 1>}]} {
    %c0 = arith.constant 0 : index
    %c0_0 = arith.constant 0 : index
    %0 = vector.load %arg1[%c0, %c0_0] : memref<8x46xf32, #tpu.memory_space<vmem>>, vector<8x46xf32>
    %1 = arith.truncf %0 : vector<8x46xf32> to vector<8x46xbf16>
    %c0_1 = arith.constant 0 : index
    %c0_2 = arith.constant 0 : index
    %2 = vector.load %arg2[%c0_1, %c0_2] : memref<46x128xbf16, #tpu.memory_space<vmem>>, vector<46x128xbf16>
    %cst = arith.constant dense<0.000000e+00> : vector<8x128xf32>
    %3 = tpu.matmul %1, %2, %cst {dimension_numbers = #tpu.dot_dimension_numbers<[1], [0], [0], [1], [0, 0, 1, 1], [], []>} : vector<8x46xbf16>, vector<46x128xbf16>, vector<8x128xf32> -> vector<8x128xf32>
    %c0_3 = arith.constant 0 : index
    %c0_4 = arith.constant 0 : index
    %4 = vector.load %arg3[%c0_3, %c0_4] : memref<1x128xf32, #tpu.memory_space<vmem>>, vector<1x128xf32>
    %5 = vector.broadcast %4 : vector<1x128xf32> to vector<8x128xf32>
    %6 = arith.addf %3, %5 : vector<8x128xf32>
    %cst_5 = arith.constant 0.000000e+00 : f32
    %7 = vector.broadcast %cst_5 : f32 to vector<8x128xf32>
    %8 = arith.maximumf %6, %7 : vector<8x128xf32>
    %9 = arith.truncf %8 : vector<8x128xf32> to vector<8x128xbf16>
    %c0_6 = arith.constant 0 : index
    %c0_7 = arith.constant 0 : index
    %10 = vector.load %arg4[%c0_6, %c0_7] : memref<128x64xbf16, #tpu.memory_space<vmem>>, vector<128x64xbf16>
    %cst_8 = arith.constant dense<0.000000e+00> : vector<8x64xf32>
    %11 = tpu.matmul %9, %10, %cst_8 {dimension_numbers = #tpu.dot_dimension_numbers<[1], [0], [0], [1], [0, 0, 1, 1], [], []>} : vector<8x128xbf16>, vector<128x64xbf16>, vector<8x64xf32> -> vector<8x64xf32>
    %c0_9 = arith.constant 0 : index
    %c0_10 = arith.constant 0 : index
    %12 = vector.load %arg5[%c0_9, %c0_10] : memref<1x64xf32, #tpu.memory_space<vmem>>, vector<1x64xf32>
    %13 = vector.broadcast %12 : vector<1x64xf32> to vector<8x64xf32>
    %14 = arith.addf %11, %13 : vector<8x64xf32>
    %cst_11 = arith.constant 0.000000e+00 : f32
    %15 = vector.broadcast %cst_11 : f32 to vector<8x64xf32>
    %16 = arith.maximumf %14, %15 : vector<8x64xf32>
    %17 = arith.truncf %16 : vector<8x64xf32> to vector<8x64xbf16>
    %c0_12 = arith.constant 0 : index
    %c0_13 = arith.constant 0 : index
    %18 = vector.load %arg6[%c0_12, %c0_13] : memref<64x32xbf16, #tpu.memory_space<vmem>>, vector<64x32xbf16>
    %cst_14 = arith.constant dense<0.000000e+00> : vector<8x32xf32>
    %19 = tpu.matmul %17, %18, %cst_14 {dimension_numbers = #tpu.dot_dimension_numbers<[1], [0], [0], [1], [0, 0, 1, 1], [], []>} : vector<8x64xbf16>, vector<64x32xbf16>, vector<8x32xf32> -> vector<8x32xf32>
    %c0_15 = arith.constant 0 : index
    %c0_16 = arith.constant 0 : index
    %20 = vector.load %arg7[%c0_15, %c0_16] : memref<1x32xf32, #tpu.memory_space<vmem>>, vector<1x32xf32>
    %21 = vector.broadcast %20 : vector<1x32xf32> to vector<8x32xf32>
    %22 = arith.addf %19, %21 : vector<8x32xf32>
    %cst_17 = arith.constant 0.000000e+00 : f32
    %23 = vector.broadcast %cst_17 : f32 to vector<8x32xf32>
    %24 = arith.maximumf %22, %23 : vector<8x32xf32>
    %c0_18 = arith.constant 0 : index
    %c0_19 = arith.constant 0 : index
    %25 = vector.load %arg8[%c0_18, %c0_19] : memref<1x32xbf16, #tpu.memory_space<vmem>>, vector<1x32xbf16>
    %26 = arith.extf %25 : vector<1x32xbf16> to vector<1x32xf32>
    %27 = vector.broadcast %26 : vector<1x32xf32> to vector<8x32xf32>
    %28 = arith.mulf %24, %27 : vector<8x32xf32>
    %cst_20 = arith.constant dense<0.000000e+00> : vector<8xf32>
    %29 = vector.multi_reduction <add>, %28, %cst_20 [1] : vector<8x32xf32> to vector<8xf32>
    %30 = vector.shape_cast %29 : vector<8xf32> to vector<8x1xf32>
    %c0_21 = arith.constant 0 : index
    %c0_22 = arith.constant 0 : index
    %31 = vector.load %arg9[%c0_21, %c0_22] : memref<1x1xf32, #tpu.memory_space<vmem>>, vector<1x1xf32>
    %32 = vector.broadcast %31 : vector<1x1xf32> to vector<8x1xf32>
    %33 = arith.addf %30, %32 : vector<8x1xf32>
    %cst_23 = arith.constant 0.000000e+00 : f32
    %34 = vector.broadcast %cst_23 : f32 to vector<8x1xf32>
    %35 = arith.maximumf %33, %34 : vector<8x1xf32>
    %c0_24 = arith.constant 0 : index
    %c0_25 = arith.constant 0 : index
    %36 = vector.load %arg10[%c0_24, %c0_25] : memref<8x1xf32, #tpu.memory_space<vmem>>, vector<8x1xf32>
    tpu.vector_store %arg10[%c0_24, %c0_25], %35 {strides = array<i32>} : memref<8x1xf32, #tpu.memory_space<vmem>>, vector<8x1xf32>,
    return
  }
  func.func @transform_0(%arg0: i32) -> (i32, i32) {
    %c0_i32 = arith.constant 0 : i32
    %c0_i32_0 = arith.constant 0 : i32
    return %arg0, %c0_i32 : i32, i32
  }
  func.func @transform_1(%arg0: i32) -> (i32, i32) {
    %c0_i32 = arith.constant 0 : i32
    %c0_i32_0 = arith.constant 0 : i32
    %c0_i32_1 = arith.constant 0 : i32
    return %c0_i32, %c0_i32_0 : i32, i32
  }
  func.func @transform_2(%arg0: i32) -> (i32, i32) {
    %c0_i32 = arith.constant 0 : i32
    %c0_i32_0 = arith.constant 0 : i32
    %c0_i32_1 = arith.constant 0 : i32
    return %c0_i32, %c0_i32_0 : i32, i32
  }
  func.func @transform_3(%arg0: i32) -> (i32, i32) {
    %c0_i32 = arith.constant 0 : i32
    %c0_i32_0 = arith.constant 0 : i32
    %c0_i32_1 = arith.constant 0 : i32
    return %c0_i32, %c0_i32_0 : i32, i32
  }
  func.func @transform_4(%arg0: i32) -> (i32, i32) {
    %c0_i32 = arith.constant 0 : i32
    %c0_i32_0 = arith.constant 0 : i32
    %c0_i32_1 = arith.constant 0 : i32
    return %c0_i32, %c0_i32_0 : i32, i32
  }
  func.func @transform_5(%arg0: i32) -> (i32, i32) {
    %c0_i32 = arith.constant 0 : i32
    %c0_i32_0 = arith.constant 0 : i32
    %c0_i32_1 = arith.constant 0 : i32
    return %c0_i32, %c0_i32_0 : i32, i32
  }
  func.func @transform_6(%arg0: i32) -> (i32, i32) {
    %c0_i32 = arith.constant 0 : i32
    %c0_i32_0 = arith.constant 0 : i32
    %c0_i32_1 = arith.constant 0 : i32
    return %c0_i32, %c0_i32_0 : i32, i32
  }
  func.func @transform_7(%arg0: i32) -> (i32, i32) {
    %c0_i32 = arith.constant 0 : i32
    %c0_i32_0 = arith.constant 0 : i32
    %c0_i32_1 = arith.constant 0 : i32
    return %c0_i32, %c0_i32_0 : i32, i32
  }
  func.func @transform_8(%arg0: i32) -> (i32, i32) {
    %c0_i32 = arith.constant 0 : i32
    %c0_i32_0 = arith.constant 0 : i32
    %c0_i32_1 = arith.constant 0 : i32
    return %c0_i32, %c0_i32_0 : i32, i32
  }
  func.func @transform_9(%arg0: i32) -> (i32, i32) {
    %c0_i32 = arith.constant 0 : i32
    %c0_i32_0 = arith.constant 0 : i32
    return %arg0, %c0_i32 : i32, i32
  }
}

</mosaic_0001>

<bundles_post_ra>
// kernel: tpu_custom_call.1
= control target key start
LH: loop header
LB: loop body
LE: loop exit
PB: predicated region body
PF: predicated region fallthrough
CT: control target
= control target key end

     0   :  { %s637_s0 = inlined_call_operand.vmem [shape: f32[8,46], index: 0, kind: input, shape index: {}]   ;;  %s638_s1 = inlined_call_operand.vmem [shape: bf16[46,128], index: 1, kind: input, shape index: {}]   ;;  %s639_s2 = inlined_call_operand.vmem [shape: f32[1,128], index: 2, kind: input, shape index: {}]   ;;  %s640_s3 = inlined_call_operand.vmem [shape: bf16[128,64], index: 3, kind: input, shape index: {}]   ;;  %s641_s4 = inlined_call_operand.vmem [shape: f32[1,64], index: 4, kind: input, shape index: {}]   ;;  %s642_s5 = inlined_call_operand.vmem [shape: bf16[64,32], index: 5, kind: input, shape index: {}]   ;;  %s643_s6 = inlined_call_operand.vmem [shape: f32[1,32], index: 6, kind: input, shape index: {}]   ;;  %s644_s7 = inlined_call_operand.vmem [shape: bf16[1,32], index: 7, kind: input, shape index: {}]   ;;  %s645_s8 = inlined_call_operand.<no memory space> [shape: f32[1,1], index: 8, kind: input, shape index: {}]   ;;  %s646_s9 = inlined_call_operand.hbm [shape: f32[1,1,8], index: 9, kind: output, shape index: {}]  }
   0x1   :  { %v14_v0 = vstv %s645_s8 }
   0x2   :  { %15 = vst [vmem:[#allocation2] sm:$0x1] %v14_v0 }
   0x3   :  { %v467_v1 = vld [vmem:[%s638_s1] sm:$0xff]   ;;  %v506_v2 = vmov 0.0   ;;  %v468_v3 = vld [vmem:[%s638_s1 + $0x8] sm:$0xff]   ;;  %v469_v4 = vld [vmem:[%s638_s1 + $0x10] sm:$0x7f]   ;;  %vm72_vm0 = vcmask 1046528  }
   0x4   :  { %422 = vmatprep.subr.bf16.mxu0 %v506_v2  ;;  %432 = vmatprep.subr.bf16.mxu1 %v506_v2  ;;  %v470_v5 = vld [vmem:[%s640_s3] sm:$0xff]   ;;  %vm507_vm1 = vmmov 0   ;;  %v471_v6 = vld [vmem:[%s640_s3 + $0x8] sm:$0xff]   ;;  %v74_v8 = vsel %vm72_vm0, %v469_v4, 0  ;;  %vm68_vm2 = vcmask 375808   ;;  %v472_v10 = vld [vmem:[%s640_s3 + $0x10] sm:$0xff]  }
   0x5   :  { %423 = vmatpush3.bf16.msra.mxu0 %v467_v1  ;;  %428 = vmatprep.mubr.msk.bf16.mxu0 %vm507_vm1, %v506_v2  ;;  %v36_v7 = vld [vmem:[%s637_s0] sm:$0xff]  ;;  %v473_v11 = vld [vmem:[%s640_s3 + $0x18] sm:$0xff]  }
   0x6   :  { %424 = vmatprep.subr.bf16.mxu0 %v506_v2  ;;  %448 = vmatprep.mubr.msk.bf16.mxu1 %vm507_vm1, %v506_v2  ;;  %v37_v9 = vpack.c.bf16 %v36_v7, %v36_v7 }
   0x7   :  { %433 = vmatpush3.bf16.msra.mxu1 %v470_v5 }
   0x8   :  { %434 = vmatprep.subr.bf16.mxu1 %v506_v2 }
   0x9   :  { %425 = vmatpush3.bf16.msra.mxu0 %v468_v3 }
   0xa   :  { %426 = vmatprep.subr.bf16.mxu0 %v506_v2 }
   0xb   :  { %435 = vmatpush3.bf16.msra.mxu1 %v471_v6 }
   0xc   :  { %436 = vmatprep.subr.bf16.mxu1 %v506_v2 }
   0xd   :  { %427 = vmatpush3.bf16.msra.mxu0 %v74_v8 }
   0xe   :  { %452 = vmatprep.subr.bf16.mxu0 %v506_v2 }
   0xf   :  { %437 = vmatpush3.bf16.msra.mxu1 %v472_v10 }
  0x10   :  { %429 = vmatmul.mubr.msk.bf16.vlgmr.msra.gmra.mrb[0].mxu0 %vm68_vm2, %v37_v9 }
  0x11   :  { %16 = vsyncpa [#allocation4], 0  ;;  %438 = vmatprep.subr.bf16.mxu1 %v506_v2  ;;  %460 = vmatprep.mubr.msk.bf16.mxu0 %vm507_vm1, %v506_v2  ;;  %v474_v12 = vld [vmem:[%s640_s3 + $0x20] sm:$0xff]   ;;  %v475_v13 = vld [vmem:[%s640_s3 + $0x28] sm:$0xff]   ;;  %vm270_vm3 = vcmask 523264   ;;  %v317_v36 = vlaneseq  ;;  %vm322_vm4 = vcmask 261120  }
  0x12   :  { %v476_v14 = vld [vmem:[%s640_s3 + $0x30] sm:$0xff]   ;;  %v477_v15 = vld [vmem:[%s640_s3 + $0x38] sm:$0xff]   ;;  %v478_v16 = vld [vmem:[%s642_s5] sm:$0xff]   ;;  %vm367_vm5 = vcmask 57344  }
  0x13   :  { %439 = vmatpush3.bf16.msra.mxu1 %v473_v11  ;;  %453 = vmatpush3.bf16.msra.mxu0 %v478_v16  ;;  %v479_v17 = vld [vmem:[%s642_s5 + $0x8] sm:$0xff]   ;;  %v383_v18 = vld [vmem:[%s639_s2] ss:$0 sm:$0xff]  ;;  %v480_v26 = vld [vmem:[%s642_s5 + $0x10] sm:$0xff]   ;;  %v318_v37 = vshrl.u32 %v317_v36, 7 }
  0x14   :  { %440 = vmatprep.subr.bf16.mxu1 %v506_v2  ;;  %454 = vmatprep.subr.bf16.mxu0 %v506_v2  ;;  %v481_v27 = vld [vmem:[%s642_s5 + $0x18] sm:$0xff]   ;;  %v388_v28 = vld [vmem:[%s641_s4] ss:$0 sm:$0xff]  ;;  %s508_s4 = smov [#allocation3]  }
  0x15   :  { %v315_v38 = vld [vmem:[%s644_s7] sm:$0x1]  ;;  %v319_v40 = vsub.s32 0, %v318_v37  ;;  %s375_s7 = sshll.u32 %s508_s4, 4  ;;  %s376_s7 = int_to_ptr.vmem [resolvable:$true] %s375_s7 }
  0x16   :  { %v316_v39 = vunpack.c.l.bf16 %v315_v38  ;;  %v397_v41 = vld [vmem:[%s643_s6] ss:$0 sm:$0xff]  ;;  %s482_s6 = scalar_lea.vmem %s376_s7, 16  ;;  %s486_s22 = scalar_lea.vmem %s376_s7, 32 }
  0x17   :  { %441 = vmatpush3.bf16.msra.mxu1 %v474_v12  ;;  %455 = vmatpush3.bf16.msra.mxu0 %v479_v17  ;;  %v403_v51 = vld [vmem:[#allocation2] ss:$0 sm:$0xff]  ;;  %p483_p0 = scmp.ne.s32.totalorder %s376_s7, %s482_s6  ;;  %p487_p1 = scmp.lt.s32.totalorder %s376_s7, %s376_s7 }
  0x18   :  { %442 = vmatprep.subr.bf16.mxu1 %v506_v2  ;;  %456 = vmatprep.subr.bf16.mxu0 %v506_v2  ;;  %v320_v45 = vrot.slane %v316_v39, %v319_v40  ;;  %p488_p2 = scmp.lt.s32.totalorder %s486_s22, %s482_s6 }
  0x1a   :  { %p489_p3 = por %p488_p2, %p487_p1 }
  0x1b   :  { %443 = vmatpush3.bf16.msra.mxu1 %v475_v13  ;;  %457 = vmatpush3.bf16.msra.mxu0 %v480_v26 }
  0x1c   :  { %444 = vmatprep.subr.bf16.mxu1 %v506_v2  ;;  %458 = vmatprep.subr.bf16.mxu0 %v506_v2  ;;  %p490_p4 = pnand %p489_p3, %p483_p0 }
  0x1f   :  { %445 = vmatpush3.bf16.msra.mxu1 %v476_v14  ;;  %459 = vmatpush3.bf16.msra.mxu0 %v481_v27 }
  0x20   :  { %446 = vmatprep.subr.bf16.mxu1 %v506_v2 }
  0x23   :  { %447 = vmatpush3.bf16.msra.mxu1 %v477_v15 }
  0xe3   :  { %v110_v19 = vpop.f32.mrb[0].mxu0 }
  0xe4   :  { %v111_v20 = vadd.f32 %v383_v18, %v110_v19  ;;  %v430_v21 = vpop.f32.mrb[1].mxu0 }
  0xe5   :  { %v113_v22 = vpop.f32.mrb[2].mxu0 }
  0xe6   :  { %v116_v23 = vmax.f32 %v111_v20, 0.0  ;;  %v431_v24 = vpop.f32.mrb[3].mxu0 }
  0xe8   :  { %v117_v25 = vpack.c.bf16 %v116_v23, %v116_v23 }
  0xea   :  { %449 = vmatmul.mubr.bf16.vlgmr.msra.gmra.mrb[0].mxu1 %v117_v25 }
 0x1bd   :  { %v223_v29 = vpop.f32.mrb[0].mxu1 }
 0x1be   :  { %v224_v30 = vadd.f32 %v388_v28, %v223_v29  ;;  %v450_v31 = vpop.f32.mrb[1].mxu1 }
 0x1bf   :  { %v226_v32 = vpop.f32.mrb[2].mxu1 }
 0x1c0   :  { %v229_v33 = vmax.f32 %v224_v30, 0.0  ;;  %v451_v34 = vpop.f32.mrb[3].mxu1 }
 0x1c2   :  { %v230_v35 = vpack.c.bf16 %v229_v33, %v229_v33 }
 0x1c4   :  { %461 = vmatmul.mubr.msk.bf16.vlgmr.msra.gmra.mrb[4].mxu0 %vm270_vm3, %v230_v35 }
 0x297   :  { %v308_v42 = vpop.f32.mrb[4].mxu0 }
 0x298   :  { %v309_v43 = vadd.f32 %v397_v41, %v308_v42  ;;  %v462_v44 = vpop.f32.mrb[5].mxu0 }
 0x299   :  { %v311_v46 = vpop.f32.mrb[6].mxu0 }
 0x29a   :  { %v314_v47 = vmax.f32 %v309_v43, 0.0  ;;  %v463_v48 = vpop.f32.mrb[7].mxu0 }
 0x29c   :  { %v321_v49 = vmul.f32 %v320_v45, %v314_v47 }
 0x29e   :  { %v323_v50 = vsel %vm322_vm4, %v321_v49, 0.0 }
 0x29f   :  { %324 = vadd.xlane.f32.xlu0 %v323_v50 }
 0x32c   :  { %v325_v52 = vpop.xlane.xlu0 %324 }
 0x32d   :  { %v333_v53 = vadd.f32 %v403_v51, %v325_v52 }
 0x32f   :  { %v334_v54 = vmax.f32 %v333_v53, 0.0 }
 0x331   :  { %335 = vxpose.xlu0.b32.start.end [1/1] (short) (narrow) %v334_v54, 8 }
 0x3b1   :  { %v351_v55 = vpop.trf.xlu0 }
 0x3b2   :  { %368 = vst.msk [vmem:[#allocation3] sm:$0x1] %vm367_vm5, %v351_v55 }
 0x3b3   :  { %493 = shalt.err (!%p490_p4)
}
 0x3b4   :  { %s494_s0 = scalar_lea.hbm %s646_s9, 16 }
 0x3b5   :  { %p495_p5 = scmp.ne.s32.totalorder %s646_s9, %s494_s0  ;;  %p498_p6 = scmp.lt.u32.totalorder %s494_s0, %s646_s9 }
 0x3b7   :  { %p500_p7 = pnand %p498_p6, %p495_p5 }
 0x3b9   :  { %503 = shalt.err (!%p500_p7)
}
 0x3ba   :  { %378 = dma.vmem_to_hbm [thread:$0]  %s376_s7, 16, %s646_s9, [#allocation4]  }
 0x3bb   :  { %504 = dma.done.wait [#allocation4], 16  }
 0x3bc   :  { %505 = vsyncadd [#allocation4], 4294967280 }
 0x3bd   :  { %382 = vsyncpa [#allocation4], 1 }

// kernel: tpu_custom_call.1
= control target key start
LH: loop header
LB: loop body
LE: loop exit
PB: predicated region body
PF: predicated region fallthrough
CT: control target
= control target key end

     0   :  { %v438_v0 = vmov 0.0   ;;  %vm439_vm0 = vmmov 0   ;;  %vm71_vm1 = vcmask 1046528   ;;  %vm67_vm2 = vcmask 375808   ;;  %s577_s1 = inlined_call_operand.vmem [shape: bf16[46,128], index: 1, kind: input, shape index: {}]   ;;  %s578_s3 = inlined_call_operand.vmem [shape: bf16[128,64], index: 3, kind: input, shape index: {}]   ;;  %s579_s0 = inlined_call_operand.vmem [shape: f32[8,46], index: 0, kind: input, shape index: {}]   ;;  %s580_s5 = inlined_call_operand.vmem [shape: bf16[64,32], index: 5, kind: input, shape index: {}]   ;;  %s581_s2 = inlined_call_operand.vmem [shape: f32[1,128], index: 2, kind: input, shape index: {}]   ;;  %s582_s4 = inlined_call_operand.vmem [shape: f32[1,64], index: 4, kind: input, shape index: {}]   ;;  %s583_s8 = inlined_call_operand.<no memory space> [shape: f32[1,1], index: 8, kind: input, shape index: {}]   ;;  %s584_s7 = inlined_call_operand.vmem [shape: bf16[1,32], index: 7, kind: input, shape index: {}]   ;;  %s585_s6 = inlined_call_operand.vmem [shape: f32[1,32], index: 6, kind: input, shape index: {}]   ;;  %s586_s9 = inlined_call_operand.vmem [shape: f32[8,1], index: 9, kind: output, shape index: {}]  }
   0x1   :  { %379 = vmatprep.subr.bf16.mxu0 %v438_v0  ;;  %v423_v1 = vld [vmem:[%s577_s1] sm:$0xff]   ;;  %385 = vmatprep.mubr.msk.bf16.mxu0 %vm439_vm0, %v438_v0  ;;  %v424_v2 = vld [vmem:[%s577_s1 + $0x8] sm:$0xff]   ;;  %v425_v3 = vld [vmem:[%s577_s1 + $0x10] sm:$0x7f]   ;;  %vm269_vm3 = vcmask 523264   ;;  %v14_v35 = vstv %s583_s8  ;;  %v316_v36 = vlaneseq  ;;  %vm321_vm4 = vcmask 261120  }
   0x2   :  { %389 = vmatprep.subr.bf16.mxu1 %v438_v0  ;;  %405 = vmatprep.mubr.msk.bf16.mxu1 %vm439_vm0, %v438_v0  ;;  %v426_v4 = vld [vmem:[%s578_s3] sm:$0xff]   ;;  %v427_v6 = vld [vmem:[%s578_s3 + $0x8] sm:$0xff]   ;;  %v73_v7 = vsel %vm71_vm1, %v425_v3, 0  ;;  %v428_v9 = vld [vmem:[%s578_s3 + $0x10] sm:$0xff]   ;;  %15 = vst [vmem:[#allocation2] sm:$0x1] %v14_v35 }
   0x3   :  { %380 = vmatpush3.bf16.msra.mxu0 %v423_v1  ;;  %v35_v5 = vld [vmem:[%s579_s0] sm:$0xff]  ;;  %390 = vmatpush3.bf16.msra.mxu1 %v426_v4  ;;  %v429_v10 = vld [vmem:[%s578_s3 + $0x18] sm:$0xff]   ;;  %v431_v12 = vld [vmem:[%s578_s3 + $0x28] sm:$0xff]   ;;  %v317_v37 = vshrl.u32 %v316_v36, 7  ;;  %vm334_vm5 = vcmask 7168  }
   0x4   :  { %381 = vmatprep.subr.bf16.mxu0 %v438_v0  ;;  %391 = vmatprep.subr.bf16.mxu1 %v438_v0  ;;  %v36_v8 = vpack.c.bf16 %v35_v5, %v35_v5  ;;  %v430_v11 = vld [vmem:[%s578_s3 + $0x20] sm:$0xff]   ;;  %v432_v13 = vld [vmem:[%s578_s3 + $0x30] sm:$0xff]   ;;  %v433_v14 = vld [vmem:[%s578_s3 + $0x38] sm:$0xff]  }
   0x5   :  { %v434_v15 = vld [vmem:[%s580_s5] sm:$0xff]   ;;  %v435_v16 = vld [vmem:[%s580_s5 + $0x8] sm:$0xff]   ;;  %v436_v25 = vld [vmem:[%s580_s5 + $0x10] sm:$0xff]   ;;  %v318_v40 = vsub.s32 0, %v317_v37 }
   0x6   :  { %v340_v17 = vld [vmem:[%s581_s2] ss:$0 sm:$0xff]  ;;  %v437_v26 = vld [vmem:[%s580_s5 + $0x18] sm:$0xff]  }
   0x7   :  { %382 = vmatpush3.bf16.msra.mxu0 %v424_v2  ;;  %392 = vmatpush3.bf16.msra.mxu1 %v427_v6  ;;  %v345_v27 = vld [vmem:[%s582_s4] ss:$0 sm:$0xff] }
   0x8   :  { %383 = vmatprep.subr.bf16.mxu0 %v438_v0  ;;  %393 = vmatprep.subr.bf16.mxu1 %v438_v0  ;;  %v314_v38 = vld [vmem:[%s584_s7] sm:$0x1] }
   0x9   :  { %v315_v39 = vunpack.c.l.bf16 %v314_v38  ;;  %v354_v41 = vld [vmem:[%s585_s6] ss:$0 sm:$0xff] }
   0xa   :  { %v360_v51 = vld [vmem:[#allocation2] ss:$0 sm:$0xff] }
   0xb   :  { %384 = vmatpush3.bf16.msra.mxu0 %v73_v7  ;;  %394 = vmatpush3.bf16.msra.mxu1 %v428_v9  ;;  %v319_v45 = vrot.slane %v315_v39, %v318_v40 }
   0xc   :  { %409 = vmatprep.subr.bf16.mxu0 %v438_v0  ;;  %395 = vmatprep.subr.bf16.mxu1 %v438_v0 }
   0xe   :  { %386 = vmatmul.mubr.msk.bf16.vlgmr.msra.gmra.mrb[0].mxu0 %vm67_vm2, %v36_v8 }
   0xf   :  { %417 = vmatprep.mubr.msk.bf16.mxu0 %vm439_vm0, %v438_v0  ;;  %396 = vmatpush3.bf16.msra.mxu1 %v429_v10 }
  0x10   :  { %397 = vmatprep.subr.bf16.mxu1 %v438_v0  ;;  %410 = vmatpush3.bf16.msra.mxu0 %v434_v15 }
  0x11   :  { %411 = vmatprep.subr.bf16.mxu0 %v438_v0 }
  0x13   :  { %398 = vmatpush3.bf16.msra.mxu1 %v430_v11 }
  0x14   :  { %399 = vmatprep.subr.bf16.mxu1 %v438_v0  ;;  %412 = vmatpush3.bf16.msra.mxu0 %v435_v16 }
  0x15   :  { %413 = vmatprep.subr.bf16.mxu0 %v438_v0 }
  0x17   :  { %400 = vmatpush3.bf16.msra.mxu1 %v431_v12 }
  0x18   :  { %401 = vmatprep.subr.bf16.mxu1 %v438_v0  ;;  %414 = vmatpush3.bf16.msra.mxu0 %v436_v25 }
  0x19   :  { %415 = vmatprep.subr.bf16.mxu0 %v438_v0 }
  0x1b   :  { %402 = vmatpush3.bf16.msra.mxu1 %v432_v13 }
  0x1c   :  { %403 = vmatprep.subr.bf16.mxu1 %v438_v0  ;;  %416 = vmatpush3.bf16.msra.mxu0 %v437_v26 }
  0x1f   :  { %404 = vmatpush3.bf16.msra.mxu1 %v433_v14 }
  0xe1   :  { %v109_v18 = vpop.f32.mrb[0].mxu0 }
  0xe2   :  { %v110_v19 = vadd.f32 %v340_v17, %v109_v18  ;;  %v387_v20 = vpop.f32.mrb[1].mxu0 }
  0xe3   :  { %v112_v21 = vpop.f32.mrb[2].mxu0 }
  0xe4   :  { %v115_v22 = vmax.f32 %v110_v19, 0.0  ;;  %v388_v23 = vpop.f32.mrb[3].mxu0 }
  0xe6   :  { %v116_v24 = vpack.c.bf16 %v115_v22, %v115_v22 }
  0xe8   :  { %406 = vmatmul.mubr.bf16.vlgmr.msra.gmra.mrb[0].mxu1 %v116_v24 }
 0x1bb   :  { %v222_v28 = vpop.f32.mrb[0].mxu1 }
 0x1bc   :  { %v223_v29 = vadd.f32 %v345_v27, %v222_v28  ;;  %v407_v30 = vpop.f32.mrb[1].mxu1 }
 0x1bd   :  { %v225_v31 = vpop.f32.mrb[2].mxu1 }
 0x1be   :  { %v228_v32 = vmax.f32 %v223_v29, 0.0  ;;  %v408_v33 = vpop.f32.mrb[3].mxu1 }
 0x1c0   :  { %v229_v34 = vpack.c.bf16 %v228_v32, %v228_v32 }
 0x1c2   :  { %418 = vmatmul.mubr.msk.bf16.vlgmr.msra.gmra.mrb[4].mxu0 %vm269_vm3, %v229_v34 }
 0x295   :  { %v307_v42 = vpop.f32.mrb[4].mxu0 }
 0x296   :  { %v308_v43 = vadd.f32 %v354_v41, %v307_v42  ;;  %v419_v44 = vpop.f32.mrb[5].mxu0 }
 0x297   :  { %v310_v46 = vpop.f32.mrb[6].mxu0 }
 0x298   :  { %v313_v47 = vmax.f32 %v308_v43, 0.0  ;;  %v420_v48 = vpop.f32.mrb[7].mxu0 }
 0x29a   :  { %v320_v49 = vmul.f32 %v319_v45, %v313_v47 }
 0x29c   :  { %v322_v50 = vsel %vm321_vm4, %v320_v49, 0.0 }
 0x29d   :  { %323 = vadd.xlane.f32.xlu0 %v322_v50 }
 0x32a   :  { %v324_v52 = vpop.xlane.xlu0 %323 }
 0x32b   :  { %v332_v53 = vadd.f32 %v360_v51, %v324_v52 }
 0x32d   :  { %v333_v54 = vmax.f32 %v332_v53, 0.0 }
 0x32f   :  { %335 = vst.msk [vmem:[%s586_s9] sm:$0xff] %vm334_vm5, %v333_v54 }

</bundles_post_ra>
